<compile_context>
chip_gen: v7x
topology: tpu7x:2x2x1
jax: 0.10.0
libtpu: 0.0.40
codegen_flags: <defaults>
</compile_context>

<pallas_src>
import functools

import jax
import jax.numpy as jnp
from jax import lax
from jax.experimental import pallas as pl
from jax.experimental.pallas import tpu as pltpu


def _dw_pool_kernel(x_ref, w_ref, b_ref, o_ref, *, K, S, HO, WO, R_CHUNK):
    """Depthwise strided conv over one (batch, channel-tile) block.

    x_ref : VMEM (S, S, Hq, Wq, CT)  phase-split, zero-padded input;
            x_ref[rh, rw, qh, qw, c] == x_pad[qh*S + rh, qw*S + rw, c]
    w_ref : VMEM (K, K, CT)          per-channel filter taps
    b_ref : VMEM (1, CT)             per-channel bias
    o_ref : VMEM (HO, WO, CT)        output plane (channels on lanes)
    """
    CT = o_ref.shape[-1]
    f32 = jnp.float32

    # Hoist weight tap vectors and bias out of all loops (loaded once).
    w_taps = [[w_ref[kh, kw, :].astype(f32) for kw in range(K)] for kh in range(K)]
    bias = b_ref[0, :].astype(f32)[None, None, :]            # (1, 1, CT)

    # Process output rows in chunks to bound the live f32 accumulator.
    for r0 in range(0, HO, R_CHUNK):
        rows = min(R_CHUNK, HO - r0)
        acc = jnp.zeros((rows, WO, CT), f32)
        for kh in range(K):
            qh, rh = divmod(kh, S)
            for kw in range(K):
                qw, rw = divmod(kw, S)
                # Tap (kh, kw) of the stride-S conv == unit-stride slice of
                # phase (rh, rw).  Slice the *ref*, not a materialized value.
                patch = x_ref[rh, rw, qh + r0:qh + r0 + rows, qw:qw + WO, :]
                # NOTE: for bf16 inputs on v6e/v7x the multiply could stay in
                # bf16; we widen to f32 for portability (v5e has no bf16 VPU).
                acc = acc + patch.astype(f32) * w_taps[kh][kw][None, None, :]
        o_ref[r0:r0 + rows, :, :] = (acc + bias).astype(o_ref.dtype)


def conv_head_pooling_forward(x, weight, bias, *, stride):
    """Forward of conv_head_pooling: grouped (depthwise) strided conv, zero pad.

    x      : (N, C_in, H, W)
    weight : (C_out, 1, K, K) with K = stride + 1  (groups = C_in)
    bias   : (C_out,)
    """
    N, C_in, H, W = x.shape
    C_out = weight.shape[0]
    assert C_out % C_in == 0
    M = C_out // C_in                 # channel multiplier per group
    K = stride + 1
    pad = stride // 2
    S = stride

    HO = (H + 2 * pad - K) // S + 1
    WO = (W + 2 * pad - K) // S + 1

    Hp, Wp = H + 2 * pad, W + 2 * pad
    Hp2 = -(-Hp // S) * S             # round padded extents up to multiples of S
    Wp2 = -(-Wp // S) * S             # (extra rows/cols are never read)
    Hq, Wq = Hp2 // S, Wp2 // S

    # ---- single wrapper-side relayout pass (fuses in XLA) -------------------
    # NCHW -> channels-last (lane-dense), replicate channels for the grouped
    # conv multiplier (output channel oc reads input channel oc // M), zero-pad,
    # and phase-split so every tap of the strided conv is a unit-stride slice.
    xr = jnp.transpose(x, (0, 2, 3, 1))                       # (N, H, W, C_in)
    if M > 1:
        xr = jnp.repeat(xr, M, axis=-1)                       # (N, H, W, C_out)
    xp = jnp.pad(xr, ((0, 0),
                      (pad, Hp2 - Hp + pad),
                      (pad, Wp2 - Wp + pad),
                      (0, 0)))
    # xph[n, rh, rw, qh, qw, c] == xp[n, qh*S + rh, qw*S + rw, c]
    xph = xp.reshape(N, Hq, S, Wq, S, C_out).transpose(0, 2, 4, 1, 3, 5)

    w_taps = jnp.transpose(weight[:, 0], (1, 2, 0)).astype(jnp.float32)  # (K,K,C_out)
    b2 = bias.reshape(1, C_out).astype(jnp.float32)

    # Channel tile: lane-dense (multiple of 128) when possible, else full C_out.
    if C_out % 256 == 0:
        C_TILE = 256
    elif C_out % 128 == 0:
        C_TILE = 128
    else:
        C_TILE = C_out

    # Bound the f32 accumulator to ~16 vregs per row chunk.
    R_CHUNK = max(1, min(HO, (16 * 1024) // max(WO * C_TILE, 1)))

    kernel = functools.partial(_dw_pool_kernel, K=K, S=S, HO=HO, WO=WO,
                               R_CHUNK=R_CHUNK)

    out_nhwc = pl.pallas_call(
        kernel,
        out_shape=jax.ShapeDtypeStruct((N, HO, WO, C_out), x.dtype),
        grid=(N, C_out // C_TILE),
        in_specs=[
            # whole phase-split padded plane for one (batch, channel tile)
            pl.BlockSpec((None, S, S, Hq, Wq, C_TILE),
                         lambda n, ct: (n, 0, 0, 0, 0, ct)),
            pl.BlockSpec((K, K, C_TILE), lambda n, ct: (0, 0, ct)),
            pl.BlockSpec((1, C_TILE), lambda n, ct: (0, ct)),
        ],
        out_specs=pl.BlockSpec((None, HO, WO, C_TILE),
                               lambda n, ct: (n, 0, 0, ct)),
        compiler_params=pltpu.CompilerParams(
            dimension_semantics=("parallel", "parallel"),
            vmem_limit_bytes=48 * 1024 * 1024),
    )(xph, w_taps, b2)

    return jnp.transpose(out_nhwc, (0, 3, 1, 2))              # back to NCHW


if __name__ == "__main__":
    # Small shapes consistent with conv_head_pooling usage.
    N, C_in, H, W = 2, 4, 16, 16
    C_out, stride = 8, 2                  # groups=C_in -> channel multiplier 2
    K = stride + 1

    key = jax.random.PRNGKey(0)
    k1, k2, k3 = jax.random.split(key, 3)
    x = jax.random.normal(k1, (N, C_in, H, W), jnp.float32)

    # Deterministic, PyTorch-Conv2d-like init (uniform in +/- 1/sqrt(fan_in)).
    fan_in = 1 * K * K
    bound = 1.0 / (fan_in ** 0.5)
    weight = jax.random.uniform(k2, (C_out, 1, K, K), jnp.float32, -bound, bound)
    bias = jax.random.uniform(k3, (C_out,), jnp.float32, -bound, bound)

    out = jax.block_until_ready(
        conv_head_pooling_forward(x, weight, bias, stride=stride))

    # Reference: XLA grouped conv (same semantics as PyTorch groups=C_in).
    ref = lax.conv_general_dilated(
        x, weight, window_strides=(stride, stride),
        padding=((stride // 2, stride // 2), (stride // 2, stride // 2)),
        dimension_numbers=("NCHW", "OIHW", "NCHW"),
        feature_group_count=C_in) + bias[None, :, None, None]

    assert out.shape == (N, C_out, H // stride, W // stride), out.shape
    assert jnp.allclose(out, ref, atol=1e-5, rtol=1e-5), \
        float(jnp.max(jnp.abs(out - ref)))
    print("KERNEL_OK")
</pallas_src>

<mosaic_0001>
module attributes {stable_mosaic.version = 11 : i64} {
  func.func @_dw_pool_kernel(%arg0: i32, %arg1: i32, %arg2: memref<1x2x2x9x9x8xf32, #tpu.memory_space<vmem>>, %arg3: memref<3x3x8xf32, #tpu.memory_space<vmem>>, %arg4: memref<1x8xf32, #tpu.memory_space<vmem>>, %arg5: memref<1x8x8x8xf32, #tpu.memory_space<vmem>>) attributes {dimension_semantics = [#tpu.dimension_semantics<parallel>, #tpu.dimension_semantics<parallel>], iteration_bounds = array<i64: 2, 1>, scalar_prefetch = 0 : i64, scratch_operands = 0 : i64, tpu.core_type = #tpu.core_type<tc>, window_params = [{transform_indices = @transform_0, window_bounds = array<i64: 1, 2, 2, 9, 9, 8>}, {transform_indices = @transform_1, window_bounds = array<i64: 3, 3, 8>}, {transform_indices = @transform_2, window_bounds = array<i64: 1, 8>}, {transform_indices = @transform_3, window_bounds = array<i64: 1, 8, 8, 8>}]} {
    %c0 = arith.constant 0 : index
    %c0_0 = arith.constant 0 : index
    %c0_1 = arith.constant 0 : index
    %0 = vector.load %arg3[%c0, %c0_0, %c0_1] : memref<3x3x8xf32, #tpu.memory_space<vmem>>, vector<1x1x8xf32>
    %1 = vector.shape_cast %0 : vector<1x1x8xf32> to vector<8xf32>
    %c0_2 = arith.constant 0 : index
    %c1 = arith.constant 1 : index
    %c0_3 = arith.constant 0 : index
    %2 = vector.load %arg3[%c0_2, %c1, %c0_3] : memref<3x3x8xf32, #tpu.memory_space<vmem>>, vector<1x1x8xf32>
    %3 = vector.shape_cast %2 : vector<1x1x8xf32> to vector<8xf32>
    %c0_4 = arith.constant 0 : index
    %c2 = arith.constant 2 : index
    %c0_5 = arith.constant 0 : index
    %4 = vector.load %arg3[%c0_4, %c2, %c0_5] : memref<3x3x8xf32, #tpu.memory_space<vmem>>, vector<1x1x8xf32>
    %5 = vector.shape_cast %4 : vector<1x1x8xf32> to vector<8xf32>
    %c1_6 = arith.constant 1 : index
    %c0_7 = arith.constant 0 : index
    %c0_8 = arith.constant 0 : index
    %6 = vector.load %arg3[%c1_6, %c0_7, %c0_8] : memref<3x3x8xf32, #tpu.memory_space<vmem>>, vector<1x1x8xf32>
    %7 = vector.shape_cast %6 : vector<1x1x8xf32> to vector<8xf32>
    %c1_9 = arith.constant 1 : index
    %c1_10 = arith.constant 1 : index
    %c0_11 = arith.constant 0 : index
    %8 = vector.load %arg3[%c1_9, %c1_10, %c0_11] : memref<3x3x8xf32, #tpu.memory_space<vmem>>, vector<1x1x8xf32>
    %9 = vector.shape_cast %8 : vector<1x1x8xf32> to vector<8xf32>
    %c1_12 = arith.constant 1 : index
    %c2_13 = arith.constant 2 : index
    %c0_14 = arith.constant 0 : index
    %10 = vector.load %arg3[%c1_12, %c2_13, %c0_14] : memref<3x3x8xf32, #tpu.memory_space<vmem>>, vector<1x1x8xf32>
    %11 = vector.shape_cast %10 : vector<1x1x8xf32> to vector<8xf32>
    %c2_15 = arith.constant 2 : index
    %c0_16 = arith.constant 0 : index
    %c0_17 = arith.constant 0 : index
    %12 = vector.load %arg3[%c2_15, %c0_16, %c0_17] : memref<3x3x8xf32, #tpu.memory_space<vmem>>, vector<1x1x8xf32>
    %13 = vector.shape_cast %12 : vector<1x1x8xf32> to vector<8xf32>
    %c2_18 = arith.constant 2 : index
    %c1_19 = arith.constant 1 : index
    %c0_20 = arith.constant 0 : index
    %14 = vector.load %arg3[%c2_18, %c1_19, %c0_20] : memref<3x3x8xf32, #tpu.memory_space<vmem>>, vector<1x1x8xf32>
    %15 = vector.shape_cast %14 : vector<1x1x8xf32> to vector<8xf32>
    %c2_21 = arith.constant 2 : index
    %c2_22 = arith.constant 2 : index
    %c0_23 = arith.constant 0 : index
    %16 = vector.load %arg3[%c2_21, %c2_22, %c0_23] : memref<3x3x8xf32, #tpu.memory_space<vmem>>, vector<1x1x8xf32>
    %17 = vector.shape_cast %16 : vector<1x1x8xf32> to vector<8xf32>
    %c0_24 = arith.constant 0 : index
    %c0_25 = arith.constant 0 : index
    %18 = vector.load %arg4[%c0_24, %c0_25] : memref<1x8xf32, #tpu.memory_space<vmem>>, vector<1x8xf32>
    %19 = vector.shape_cast %18 : vector<1x8xf32> to vector<8xf32>
    %20 = vector.shape_cast %19 : vector<8xf32> to vector<1x1x8xf32>
    %cst = arith.constant 0.000000e+00 : f32
    %21 = vector.broadcast %cst : f32 to vector<8x8x8xf32>
    %c0_26 = arith.constant 0 : index
    %c0_27 = arith.constant 0 : index
    %c0_28 = arith.constant 0 : index
    %c0_29 = arith.constant 0 : index
    %c0_30 = arith.constant 0 : index
    %c0_31 = arith.constant 0 : index
    %22 = vector.load %arg2[%c0_26, %c0_27, %c0_28, %c0_29, %c0_30, %c0_31] : memref<1x2x2x9x9x8xf32, #tpu.memory_space<vmem>>, vector<1x1x1x8x8x8xf32>
    %23 = vector.shape_cast %22 : vector<1x1x1x8x8x8xf32> to vector<8x8x8xf32>
    %24 = vector.shape_cast %1 : vector<8xf32> to vector<1x1x8xf32>
    %25 = vector.broadcast %24 : vector<1x1x8xf32> to vector<8x8x8xf32>
    %26 = arith.mulf %23, %25 : vector<8x8x8xf32>
    %27 = arith.addf %21, %26 : vector<8x8x8xf32>
    %c0_32 = arith.constant 0 : index
    %c0_33 = arith.constant 0 : index
    %c1_34 = arith.constant 1 : index
    %c0_35 = arith.constant 0 : index
    %c0_36 = arith.constant 0 : index
    %c0_37 = arith.constant 0 : index
    %28 = vector.load %arg2[%c0_32, %c0_33, %c1_34, %c0_35, %c0_36, %c0_37] : memref<1x2x2x9x9x8xf32, #tpu.memory_space<vmem>>, vector<1x1x1x8x8x8xf32>
    %29 = vector.shape_cast %28 : vector<1x1x1x8x8x8xf32> to vector<8x8x8xf32>
    %30 = vector.shape_cast %3 : vector<8xf32> to vector<1x1x8xf32>
    %31 = vector.broadcast %30 : vector<1x1x8xf32> to vector<8x8x8xf32>
    %32 = arith.mulf %29, %31 : vector<8x8x8xf32>
    %33 = arith.addf %27, %32 : vector<8x8x8xf32>
    %c0_38 = arith.constant 0 : index
    %c0_39 = arith.constant 0 : index
    %c0_40 = arith.constant 0 : index
    %c0_41 = arith.constant 0 : index
    %c1_42 = arith.constant 1 : index
    %c0_43 = arith.constant 0 : index
    %34 = vector.load %arg2[%c0_38, %c0_39, %c0_40, %c0_41, %c1_42, %c0_43] : memref<1x2x2x9x9x8xf32, #tpu.memory_space<vmem>>, vector<1x1x1x8x8x8xf32>
    %35 = vector.shape_cast %34 : vector<1x1x1x8x8x8xf32> to vector<8x8x8xf32>
    %36 = vector.shape_cast %5 : vector<8xf32> to vector<1x1x8xf32>
    %37 = vector.broadcast %36 : vector<1x1x8xf32> to vector<8x8x8xf32>
    %38 = arith.mulf %35, %37 : vector<8x8x8xf32>
    %39 = arith.addf %33, %38 : vector<8x8x8xf32>
    %c0_44 = arith.constant 0 : index
    %c1_45 = arith.constant 1 : index
    %c0_46 = arith.constant 0 : index
    %c0_47 = arith.constant 0 : index
    %c0_48 = arith.constant 0 : index
    %c0_49 = arith.constant 0 : index
    %40 = vector.load %arg2[%c0_44, %c1_45, %c0_46, %c0_47, %c0_48, %c0_49] : memref<1x2x2x9x9x8xf32, #tpu.memory_space<vmem>>, vector<1x1x1x8x8x8xf32>
    %41 = vector.shape_cast %40 : vector<1x1x1x8x8x8xf32> to vector<8x8x8xf32>
    %42 = vector.shape_cast %7 : vector<8xf32> to vector<1x1x8xf32>
    %43 = vector.broadcast %42 : vector<1x1x8xf32> to vector<8x8x8xf32>
    %44 = arith.mulf %41, %43 : vector<8x8x8xf32>
    %45 = arith.addf %39, %44 : vector<8x8x8xf32>
    %c0_50 = arith.constant 0 : index
    %c1_51 = arith.constant 1 : index
    %c1_52 = arith.constant 1 : index
    %c0_53 = arith.constant 0 : index
    %c0_54 = arith.constant 0 : index
    %c0_55 = arith.constant 0 : index
    %46 = vector.load %arg2[%c0_50, %c1_51, %c1_52, %c0_53, %c0_54, %c0_55] : memref<1x2x2x9x9x8xf32, #tpu.memory_space<vmem>>, vector<1x1x1x8x8x8xf32>
    %47 = vector.shape_cast %46 : vector<1x1x1x8x8x8xf32> to vector<8x8x8xf32>
    %48 = vector.shape_cast %9 : vector<8xf32> to vector<1x1x8xf32>
    %49 = vector.broadcast %48 : vector<1x1x8xf32> to vector<8x8x8xf32>
    %50 = arith.mulf %47, %49 : vector<8x8x8xf32>
    %51 = arith.addf %45, %50 : vector<8x8x8xf32>
    %c0_56 = arith.constant 0 : index
    %c1_57 = arith.constant 1 : index
    %c0_58 = arith.constant 0 : index
    %c0_59 = arith.constant 0 : index
    %c1_60 = arith.constant 1 : index
    %c0_61 = arith.constant 0 : index
    %52 = vector.load %arg2[%c0_56, %c1_57, %c0_58, %c0_59, %c1_60, %c0_61] : memref<1x2x2x9x9x8xf32, #tpu.memory_space<vmem>>, vector<1x1x1x8x8x8xf32>
    %53 = vector.shape_cast %52 : vector<1x1x1x8x8x8xf32> to vector<8x8x8xf32>
    %54 = vector.shape_cast %11 : vector<8xf32> to vector<1x1x8xf32>
    %55 = vector.broadcast %54 : vector<1x1x8xf32> to vector<8x8x8xf32>
    %56 = arith.mulf %53, %55 : vector<8x8x8xf32>
    %57 = arith.addf %51, %56 : vector<8x8x8xf32>
    %c0_62 = arith.constant 0 : index
    %c0_63 = arith.constant 0 : index
    %c0_64 = arith.constant 0 : index
    %c1_65 = arith.constant 1 : index
    %c0_66 = arith.constant 0 : index
    %c0_67 = arith.constant 0 : index
    %58 = vector.load %arg2[%c0_62, %c0_63, %c0_64, %c1_65, %c0_66, %c0_67] : memref<1x2x2x9x9x8xf32, #tpu.memory_space<vmem>>, vector<1x1x1x8x8x8xf32>
    %59 = vector.shape_cast %58 : vector<1x1x1x8x8x8xf32> to vector<8x8x8xf32>
    %60 = vector.shape_cast %13 : vector<8xf32> to vector<1x1x8xf32>
    %61 = vector.broadcast %60 : vector<1x1x8xf32> to vector<8x8x8xf32>
    %62 = arith.mulf %59, %61 : vector<8x8x8xf32>
    %63 = arith.addf %57, %62 : vector<8x8x8xf32>
    %c0_68 = arith.constant 0 : index
    %c0_69 = arith.constant 0 : index
    %c1_70 = arith.constant 1 : index
    %c1_71 = arith.constant 1 : index
    %c0_72 = arith.constant 0 : index
    %c0_73 = arith.constant 0 : index
    %64 = vector.load %arg2[%c0_68, %c0_69, %c1_70, %c1_71, %c0_72, %c0_73] : memref<1x2x2x9x9x8xf32, #tpu.memory_space<vmem>>, vector<1x1x1x8x8x8xf32>
    %65 = vector.shape_cast %64 : vector<1x1x1x8x8x8xf32> to vector<8x8x8xf32>
    %66 = vector.shape_cast %15 : vector<8xf32> to vector<1x1x8xf32>
    %67 = vector.broadcast %66 : vector<1x1x8xf32> to vector<8x8x8xf32>
    %68 = arith.mulf %65, %67 : vector<8x8x8xf32>
    %69 = arith.addf %63, %68 : vector<8x8x8xf32>
    %c0_74 = arith.constant 0 : index
    %c0_75 = arith.constant 0 : index
    %c0_76 = arith.constant 0 : index
    %c1_77 = arith.constant 1 : index
    %c1_78 = arith.constant 1 : index
    %c0_79 = arith.constant 0 : index
    %70 = vector.load %arg2[%c0_74, %c0_75, %c0_76, %c1_77, %c1_78, %c0_79] : memref<1x2x2x9x9x8xf32, #tpu.memory_space<vmem>>, vector<1x1x1x8x8x8xf32>
    %71 = vector.shape_cast %70 : vector<1x1x1x8x8x8xf32> to vector<8x8x8xf32>
    %72 = vector.shape_cast %17 : vector<8xf32> to vector<1x1x8xf32>
    %73 = vector.broadcast %72 : vector<1x1x8xf32> to vector<8x8x8xf32>
    %74 = arith.mulf %71, %73 : vector<8x8x8xf32>
    %75 = arith.addf %69, %74 : vector<8x8x8xf32>
    %76 = vector.broadcast %20 : vector<1x1x8xf32> to vector<8x8x8xf32>
    %77 = arith.addf %75, %76 : vector<8x8x8xf32>
    %c0_80 = arith.constant 0 : index
    %c0_81 = arith.constant 0 : index
    %c0_82 = arith.constant 0 : index
    %c0_83 = arith.constant 0 : index
    %78 = vector.load %arg5[%c0_80, %c0_81, %c0_82, %c0_83] : memref<1x8x8x8xf32, #tpu.memory_space<vmem>>, vector<1x8x8x8xf32>
    %79 = vector.shape_cast %78 : vector<1x8x8x8xf32> to vector<8x8x8xf32>
    %80 = vector.shape_cast %77 : vector<8x8x8xf32> to vector<1x8x8x8xf32>
    tpu.vector_store %arg5[%c0_80, %c0_81, %c0_82, %c0_83], %80 {strides = array<i32>} : memref<1x8x8x8xf32, #tpu.memory_space<vmem>>, vector<1x8x8x8xf32>,
    return
  }
  func.func @transform_0(%arg0: i32, %arg1: i32) -> (i32, i32, i32, i32, i32, i32) {
    %c0_i32 = arith.constant 0 : i32
    %c0_i32_0 = arith.constant 0 : i32
    %c0_i32_1 = arith.constant 0 : i32
    %c0_i32_2 = arith.constant 0 : i32
    %c0_i32_3 = arith.constant 0 : i32
    return %arg0, %c0_i32, %c0_i32_0, %c0_i32_1, %c0_i32_2, %arg1 : i32, i32, i32, i32, i32, i32
  }
  func.func @transform_1(%arg0: i32, %arg1: i32) -> (i32, i32, i32) {
    %c0_i32 = arith.constant 0 : i32
    %c0_i32_0 = arith.constant 0 : i32
    %c0_i32_1 = arith.constant 0 : i32
    return %c0_i32, %c0_i32_0, %arg1 : i32, i32, i32
  }
  func.func @transform_2(%arg0: i32, %arg1: i32) -> (i32, i32) {
    %c0_i32 = arith.constant 0 : i32
    %c0_i32_0 = arith.constant 0 : i32
    return %c0_i32, %arg1 : i32, i32
  }
  func.func @transform_3(%arg0: i32, %arg1: i32) -> (i32, i32, i32, i32) {
    %c0_i32 = arith.constant 0 : i32
    %c0_i32_0 = arith.constant 0 : i32
    %c0_i32_1 = arith.constant 0 : i32
    return %arg0, %c0_i32, %c0_i32_0, %arg1 : i32, i32, i32, i32
  }
}

</mosaic_0001>

<bundles_post_ra>
// kernel: tpu_custom_call.1
= control target key start
LH: loop header
LB: loop body
LE: loop exit
PB: predicated region body
PF: predicated region fallthrough
CT: control target
= control target key end

     0   :  { %8 = vsyncpa [#allocation3], 0  ;;  %s1215_s0 = inlined_call_operand.vmem [shape: f32[2,2,2,9,9,8], index: 0, kind: input, shape index: {}]   ;;  %s1216_s1 = inlined_call_operand.vmem [shape: f32[3,3,8], index: 1, kind: input, shape index: {}]   ;;  %s1217_s2 = inlined_call_operand.vmem [shape: f32[1,8], index: 2, kind: input, shape index: {}]   ;;  %s1218_s3 = inlined_call_operand.hbm [shape: f32[2,8,8,8], index: 3, kind: output, shape index: {}]  }
   0x1   :  { %10 = vsyncpa [#allocation3 + $0x1], 0  ;;  %s885_s12 = smov 0   ;;  %s887_s13 = smov 0  }
   0x2   :  { %s889_s14 = smov 0   ;;  %s891_s15 = smov 0  }
   0x3   :  { %s893_s16 = smov 0   ;;  %s895_s17 = smov 0  }
   0x4 LB: > { %s637_s18 = sadd.s32 4294967295, %s860_s17   ;;  %s638_s19 = sadd.s32 4294967294, %s860_s17   ;;  %s860_s17 = sphi %s895_s17, %s16_s17   ;;  %s856_s16 = sphi %s893_s16, %s1225_s16   ;;  %s852_s15 = sphi %s891_s15, %s1224_s15   ;;  %s848_s14 = sphi %s889_s14, %s1223_s14   ;;  %s844_s13 = sphi %s887_s13, %s1222_s13   ;;  %s840_s12 = sphi %s885_s12, %s1221_s12  }
   0x5   : > { %s28_s20 = sadd.s32 1, %s856_s16  ;;  %s117_s21 = sadd.s32 1, %s848_s14 }
   0x6   : > { %p30_p0 = scmp.ge.s32.totalorder %s28_s20, 2  ;;  %p127_p1 = scmp.ne.s32.totalorder %s848_s14, %s844_s13 }
   0x7   : > { %p128_p2 = scmp.eq.s32.totalorder %s637_s18, 1  ;;  %p133_p3 = scmp.ne.s32.totalorder %s844_s13, %s840_s12 }
   0x8   : > { %s1227_s20 = smov (%p30_p0, %s28_s20), 0  ;;  %p134_p5 = scmp.eq.s32.totalorder %s638_s19, 1 }
   0x9   : > { %p925_p4 = por %p128_p2, %p127_p1  ;;  %s112_s23 = ssub.s32 %s856_s16, %s1227_s20 }
   0xa   : > { %p643_p6 = scmp.ge.s32.totalorder %s860_s17, 1  ;;  %p115_p7 = scmp.eq.s32.totalorder %s112_s23, 0 }
   0xb   : > { %p932_p8 = por %p134_p5, %p133_p3  ;;  %p176_p9 = scmp.lt.s32.totalorder %s860_s17, 3 }
   0xc   : > { %s938_s25 = scalar_select %p115_p7, %s848_s14, %s117_s21  }
   0xd   : > { %p177_p10 = pnand %p643_p6, %p176_p9 }
   0xe   : > { %p210_p11 = scmp.lt.s32.totalorder (!%p177_p10), %s852_s15, 1  ;;  %v945_v0 = vld [vmem:[%s1216_s1] ss:$0 sm:$0xff] (!%p177_p10)  ;;  %v950_v1 = vld [vmem:[%s1216_s1 + $0x1] ss:$0 sm:$0xff] (!%p177_p10)  ;;  %vm508_vm0 = vcmask (!%p177_p10), 64512  }
   0xf   : > { %180 = sbr.rel (%p177_p10) target bundleno = 91 (0x5b), region = 32  ;;  %v955_v2 = vld [vmem:[%s1216_s1 + $0x2] ss:$0 sm:$0xff] (!%p177_p10)  ;;  %v960_v3 = vld [vmem:[%s1216_s1 + $0x4] ss:$0 sm:$0xff] (!%p177_p10)  ;;  %s207_s5 = sand.u32 (!%p177_p10), 1, %s844_s13  }
  0x10   : > { %v970_v4 = vld [vmem:[%s1216_s1 + $0x5] ss:$0 sm:$0xff] (!%p177_p10)  ;;  %v975_v5 = vld [vmem:[%s1216_s1 + $0x6] ss:$0 sm:$0xff] (!%p177_p10)  ;;  %v980_v6 = vld [vmem:[%s1216_s1 + $0x8] ss:$0 sm:$0xff] (!%p177_p10) }
  0x11   : > { %v985_v7 = vld [vmem:[%s1216_s1 + $0x9] ss:$0 sm:$0xff] (!%p177_p10)  ;;  %v990_v8 = vld [vmem:[%s1216_s1 + $0xa] ss:$0 sm:$0xff] (!%p177_p10)  ;;  %s1062_s6 = sshll.u32 (!%p177_p10), %s207_s5, 6  ;;  %s723_s18 = sshll.u32 (!%p177_p10), %s852_s15, 10 }
  0x12   : > { %s1088_s9 = scalar_lea.vmem (!%p177_p10), [#allocation2], %s1062_s6  ;;  %s1162_s21 = scalar_lea.hbm (!%p177_p10), %s1218_s3, %s723_s18 }
  0x13   : > { %s532_s10 = sshll.u32 (!%p177_p10), %s1088_s9, 4  ;;  %s1169_s23 = scalar_lea.sflag (!%p177_p10), [#allocation3], %s207_s5  ;;  %s1157_s10 = int_to_ptr.vmem [resolvable:$true] %s532_s10 }
  0x16   : > { %s211_s26 = scalar_select %p210_p11, %s852_s15, 1 }
  0x17   : > { %s782_s15 = scalar_lea.vmem %s1157_s10, 1024 }
  0x18   : > { %s724_s27 = smul.u32 576, %s211_s26  ;;  %p783_p12 = scmp.ne.s32.totalorder %s1157_s10, %s782_s15 }
  0x19   : > { %s862_s26 = smov [#allocation2]  }
  0x1a   : > { %s965_s11 = scalar_lea.vmem %s1215_s0, %s724_s27  ;;  %p784_p13 = pnand %p783_p12, %p925_p4 }
  0x1b   : > { %v237_v9 = vld [vmem:[%s965_s11] sm:$0xff]  ;;  %v653_v10 = vld [vmem:[%s965_s11 + $0x90] sm:$0xff]  ;;  %s786_s27 = sshll.u32 %s862_s26, 4  ;;  %s787_s27 = int_to_ptr.vmem [resolvable:$false] %s786_s27 }
  0x1c   : > { %v294_v11 = vld [vmem:[%s965_s11 + $0x1] sm:$0xff]  ;;  %v249_v12 = vmul.f32 %v945_v0, %v237_v9  ;;  %v278_v13 = vmul.f32 %v950_v1, %v653_v10  ;;  %v672_v16 = vld [vmem:[%s965_s11 + $0x1b0] sm:$0xff]  ;;  %p785_p0 = pneg %p784_p13  ;;  %s788_s28 = scalar_lea.vmem %s787_s27, 2048 }
  0x1d   : > { %v306_v14 = vmul.f32 %v955_v2, %v294_v11  ;;  %v663_v15 = vld [vmem:[%s965_s11 + $0x120] sm:$0xff]  ;;  %v690_v18 = vld [vmem:[%s965_s11 + $0x10] sm:$0xff]  ;;  %v364_v23 = vmul.f32 %v970_v4, %v672_v16  ;;  %p789_p1 = scmp.lt.s32.totalorder %s1157_s10, %s787_s27  ;;  %p790_p2 = scmp.lt.s32.totalorder %s788_s28, %s782_s15 }
  0x1e   : > { %v681_v17 = vld [vmem:[%s965_s11 + $0x121] sm:$0xff]  ;;  %v708_v20 = vld [vmem:[%s965_s11 + $0x11] sm:$0xff]  ;;  %v286_v21 = vadd.f32 %v278_v13, %v249_v12  ;;  %v335_v22 = vmul.f32 %v960_v3, %v663_v15  ;;  %v421_v28 = vmul.f32 %v980_v6, %v690_v18  ;;  %v250_v29 = vmul.f32 %v690_v18, %v945_v0 }
  0x1f   : > { %v699_v19 = vld [vmem:[%s965_s11 + $0xa0] sm:$0xff]  ;;  %v392_v24 = vmul.f32 %v975_v5, %v681_v17  ;;  %v664_v25 = vld [vmem:[%s965_s11 + $0x130] sm:$0xff]  ;;  %v307_v31 = vmul.f32 %v708_v20, %v955_v2  ;;  %v1019_v37 = vmul.f32 %v990_v8, %v708_v20  ;;  %p791_p3 = por %p790_p2, %p789_p1 }
  0x20   : > { %v673_v26 = vld [vmem:[%s965_s11 + $0x1c0] sm:$0xff]  ;;  %v682_v27 = vld [vmem:[%s965_s11 + $0x131] sm:$0xff]  ;;  %v279_v30 = vmul.f32 %v699_v19, %v950_v1  ;;  %v314_v35 = vadd.f32 %v306_v14, %v286_v21  ;;  %v450_v36 = vmul.f32 %v985_v7, %v699_v19  ;;  %v336_v38 = vmul.f32 %v960_v3, %v664_v25 }
  0x21   : > { %v691_v32 = vld [vmem:[%s965_s11 + $0x20] sm:$0xff]  ;;  %v700_v33 = vld [vmem:[%s965_s11 + $0xb0] sm:$0xff]  ;;  %v365_v41 = vmul.f32 %v970_v4, %v673_v26  ;;  %v393_v42 = vmul.f32 %v975_v5, %v682_v27  ;;  %p792_p5 = pnand %p791_p3, %p785_p0 }
  0x22   : > { %v709_v34 = vld [vmem:[%s965_s11 + $0x21] sm:$0xff]  ;;  %v287_v40 = vadd.f32 %v279_v30, %v250_v29  ;;  %v251_v43 = vmul.f32 %v691_v32, %v945_v0  ;;  %v674_v44 = vld [vmem:[%s965_s11 + $0x1d0] sm:$0xff]  ;;  %v343_v46 = vadd.f32 %v335_v22, %v314_v35  ;;  %v422_v47 = vmul.f32 %v980_v6, %v691_v32 }
  0x23   : > { %v665_v39 = vld [vmem:[%s965_s11 + $0x140] sm:$0xff]  ;;  %v280_v48 = vmul.f32 %v700_v33, %v950_v1  ;;  %v308_v49 = vmul.f32 %v709_v34, %v955_v2  ;;  %v692_v50 = vld [vmem:[%s965_s11 + $0x30] sm:$0xff]  ;;  %v451_v54 = vmul.f32 %v985_v7, %v700_v33  ;;  %v1036_v55 = vmul.f32 %v990_v8, %v709_v34 }
  0x24   : > { %v683_v45 = vld [vmem:[%s965_s11 + $0x141] sm:$0xff]  ;;  %v710_v52 = vld [vmem:[%s965_s11 + $0x31] sm:$0xff]  ;;  %v315_v53 = vadd.f32 %v307_v31, %v287_v40  ;;  %v337_v56 = vmul.f32 %v960_v3, %v665_v39  ;;  %v372_v57 = vadd.f32 %v364_v23, %v343_v46  ;;  %v366_v59 = vmul.f32 %v970_v4, %v674_v44  ;;  %v1070_v40 = vld [vmem:[%s1217_s2] ss:$0 sm:$0xff] }
  0x25   : > { %v701_v51 = vld [vmem:[%s965_s11 + $0xc0] sm:$0xff]  ;;  %v288_v58 = vadd.f32 %v280_v48, %v251_v43  ;;  %v394_v60 = vmul.f32 %v975_v5, %v683_v45  ;;  %v666_v61 = vld [vmem:[%s965_s11 + $0x150] sm:$0xff]  ;;  %v252_v63 = vmul.f32 %v692_v50, %v945_v0  ;;  %v309_v10 = vmul.f32 %v710_v52, %v955_v2 }
  0x26   : > { %v344_v62 = vadd.f32 %v336_v38, %v315_v53  ;;  %v281_v9 = vmul.f32 %v701_v51, %v950_v1  ;;  %v675_v11 = vld [vmem:[%s965_s11 + $0x1e0] sm:$0xff]  ;;  %v684_v12 = vld [vmem:[%s965_s11 + $0x151] sm:$0xff]  ;;  %v400_v13 = vadd.f32 %v392_v24, %v372_v57  ;;  %v423_v15 = vmul.f32 %v980_v6, %v692_v50 }
  0x27   : > { %v316_v14 = vadd.f32 %v308_v49, %v288_v58  ;;  %v452_v16 = vmul.f32 %v985_v7, %v701_v51  ;;  %v693_v17 = vld [vmem:[%s965_s11 + $0x40] sm:$0xff]  ;;  %v702_v18 = vld [vmem:[%s965_s11 + $0xd0] sm:$0xff]  ;;  %v480_v20 = vmul.f32 %v990_v8, %v710_v52  ;;  %v338_v22 = vmul.f32 %v960_v3, %v666_v61 }
  0x28   : > { %v373_v19 = vadd.f32 %v365_v41, %v344_v62  ;;  %v289_v21 = vadd.f32 %v281_v9, %v252_v63  ;;  %v711_v23 = vld [vmem:[%s965_s11 + $0x41] sm:$0xff]  ;;  %v429_v25 = vadd.f32 %v421_v28, %v400_v13  ;;  %v367_v26 = vmul.f32 %v970_v4, %v675_v11  ;;  %v676_v39 = vld [vmem:[%s965_s11 + $0x1f0] sm:$0xff] }
  0x29   : > { %v345_v24 = vadd.f32 %v337_v56, %v316_v14  ;;  %v395_v27 = vmul.f32 %v975_v5, %v684_v12  ;;  %v667_v29 = vld [vmem:[%s965_s11 + $0x160] sm:$0xff]  ;;  %v253_v32 = vmul.f32 %v693_v17, %v945_v0  ;;  %v282_v33 = vmul.f32 %v702_v18, %v950_v1  ;;  %v694_v45 = vld [vmem:[%s965_s11 + $0x50] sm:$0xff] }
  0x2a   : > { %v401_v30 = vadd.f32 %v393_v42, %v373_v19  ;;  %v317_v31 = vadd.f32 %v309_v10, %v289_v21  ;;  %v458_v34 = vadd.f32 %v450_v36, %v429_v25  ;;  %v424_v35 = vmul.f32 %v980_v6, %v693_v17  ;;  %v685_v36 = vld [vmem:[%s965_s11 + $0x161] sm:$0xff]  ;;  %v712_v57 = vld [vmem:[%s965_s11 + $0x51] sm:$0xff] }
  0x2b   : > { %v374_v28 = vadd.f32 %v366_v59, %v345_v24  ;;  %v310_v38 = vmul.f32 %v711_v23, %v955_v2  ;;  %v290_v43 = vadd.f32 %v282_v33, %v253_v32  ;;  %v339_v44 = vmul.f32 %v960_v3, %v667_v29  ;;  %v703_v51 = vld [vmem:[%s965_s11 + $0xe0] sm:$0xff]  ;;  %v668_v58 = vld [vmem:[%s965_s11 + $0x170] sm:$0xff] }
  0x2c   : > { %v430_v41 = vadd.f32 %v422_v47, %v401_v30  ;;  %v346_v42 = vadd.f32 %v338_v22, %v317_v31  ;;  %v486_v46 = vadd.f32 %v1019_v37, %v458_v34  ;;  %v453_v49 = vmul.f32 %v985_v7, %v702_v18  ;;  %v677_v13 = vld [vmem:[%s965_s11 + $0x200] sm:$0xff]  ;;  %v704_v21 = vld [vmem:[%s965_s11 + $0xf0] sm:$0xff] }
  0x2d   : > { %v402_v48 = vadd.f32 %v394_v60, %v374_v28  ;;  %v481_v50 = vmul.f32 %v990_v8, %v711_v23  ;;  %v318_v56 = vadd.f32 %v310_v38, %v290_v43  ;;  %v368_v47 = vmul.f32 %v970_v4, %v676_v39  ;;  %v695_v19 = vld [vmem:[%s965_s11 + $0x60] sm:$0xff]  ;;  %v686_v24 = vld [vmem:[%s965_s11 + $0x171] sm:$0xff] }
  0x2e   : > { %v459_v52 = vadd.f32 %v451_v54, %v430_v41  ;;  %v375_v53 = vadd.f32 %v367_v26, %v346_v42  ;;  %v500_v59 = vadd.f32 %v1070_v40, %v486_v46  ;;  %v396_v37 = vmul.f32 %v975_v5, %v685_v36  ;;  %v713_v22 = vld [vmem:[%s965_s11 + $0x61] sm:$0xff]  ;;  %v678_v41 = vld [vmem:[%s965_s11 + $0x210] sm:$0xff] }
  0x2f   : > { %v431_v61 = vadd.f32 %v423_v15, %v402_v48  ;;  %v254_v60 = vmul.f32 %v694_v45, %v945_v0  ;;  %v347_v54 = vadd.f32 %v339_v44, %v318_v56  ;;  %v283_v9 = vmul.f32 %v703_v51, %v950_v1  ;;  %v669_v31 = vld [vmem:[%s965_s11 + $0x180] sm:$0xff]  ;;  %v696_v42 = vld [vmem:[%s965_s11 + $0x70] sm:$0xff] }
  0x30   : > { %v487_v62 = vadd.f32 %v1036_v55, %v459_v52  ;;  %v403_v63 = vadd.f32 %v395_v27, %v375_v53  ;;  %509 = vst.msk [vmem:[%s1088_s9] sm:$0xff] %vm508_vm0, %v500_v59  ;;  %v425_v11 = vmul.f32 %v980_v6, %v694_v45  ;;  %v311_v12 = vmul.f32 %v712_v57, %v955_v2  ;;  %v705_v43 = vld [vmem:[%s965_s11 + $0x100] sm:$0xff]  ;;  %v714_v45 = vld [vmem:[%s965_s11 + $0x71] sm:$0xff] }
  0x31   : > { %v460_v10 = vadd.f32 %v452_v16, %v431_v61  ;;  %v340_v55 = vmul.f32 %v960_v3, %v668_v58  ;;  %v376_v17 = vadd.f32 %v368_v47, %v347_v54  ;;  %v291_v18 = vadd.f32 %v283_v9, %v254_v60  ;;  %v670_v52 = vld [vmem:[%s965_s11 + $0x190] sm:$0xff]  ;;  %v679_v60 = vld [vmem:[%s965_s11 + $0x220] sm:$0xff] }
  0x32   : > { %v501_v14 = vadd.f32 %v1070_v40, %v487_v62  ;;  %v432_v15 = vadd.f32 %v424_v35, %v403_v63  ;;  %v454_v16 = vmul.f32 %v985_v7, %v703_v51  ;;  %v482_v25 = vmul.f32 %v990_v8, %v712_v57  ;;  %v687_v51 = vld [vmem:[%s965_s11 + $0x181] sm:$0xff] }
  0x33   : > { %v488_v23 = vadd.f32 %v480_v20, %v460_v10  ;;  %v404_v27 = vadd.f32 %v396_v37, %v376_v17  ;;  %v319_v29 = vadd.f32 %v311_v12, %v291_v18  ;;  %v369_v30 = vmul.f32 %v970_v4, %v677_v13 }
  0x34   : > { %510 = vst.msk [vmem:[%s1088_s9 + $0x8] sm:$0xff] %vm508_vm0, %v501_v14  ;;  %v461_v26 = vadd.f32 %v453_v49, %v432_v15  ;;  %v255_v32 = vmul.f32 %v695_v19, %v945_v0  ;;  %v284_v33 = vmul.f32 %v704_v21, %v950_v1  ;;  %v312_v34 = vmul.f32 %v713_v22, %v955_v2  ;;  %v697_v15 = vld [vmem:[%s965_s11 + $0x80] sm:$0xff] }
  0x35   : > { %v502_v20 = vadd.f32 %v1070_v40, %v488_v23  ;;  %v433_v35 = vadd.f32 %v425_v11, %v404_v27  ;;  %v348_v38 = vadd.f32 %v340_v55, %v319_v29  ;;  %v397_v39 = vmul.f32 %v975_v5, %v686_v24  ;;  %v688_v11 = vld [vmem:[%s965_s11 + $0x191] sm:$0xff] }
  0x36   : > { %v489_v28 = vadd.f32 %v481_v50, %v461_v26  ;;  %v292_v44 = vadd.f32 %v284_v33, %v255_v32  ;;  %v341_v36 = vmul.f32 %v960_v3, %v669_v31  ;;  %v426_v50 = vmul.f32 %v980_v6, %v695_v19  ;;  %v715_v26 = vld [vmem:[%s965_s11 + $0x81] sm:$0xff] }
  0x37   : > { %511 = vst.msk [vmem:[%s1088_s9 + $0x10] sm:$0xff] %vm508_vm0, %v502_v20  ;;  %v462_v48 = vadd.f32 %v454_v16, %v433_v35  ;;  %v377_v49 = vadd.f32 %v369_v30, %v348_v38  ;;  %v370_v56 = vmul.f32 %v970_v4, %v678_v41  ;;  %v256_v47 = vmul.f32 %v696_v42, %v945_v0 }
  0x38   : > { %v503_v46 = vadd.f32 %v1070_v40, %v489_v28  ;;  %v320_v53 = vadd.f32 %v312_v34, %v292_v44  ;;  %v285_v57 = vmul.f32 %v705_v43, %v950_v1  ;;  %v455_v61 = vmul.f32 %v985_v7, %v704_v21 }
  0x39   : > { %v490_v58 = vadd.f32 %v482_v25, %v462_v48  ;;  %v405_v59 = vadd.f32 %v397_v39, %v377_v49  ;;  %v313_v37 = vmul.f32 %v714_v45, %v955_v2  ;;  %v398_v63 = vmul.f32 %v975_v5, %v687_v51 }
  0x3a   : > { %512 = vst.msk [vmem:[%s1088_s9 + $0x18] sm:$0xff] %vm508_vm0, %v503_v46  ;;  %v349_v62 = vadd.f32 %v341_v36, %v320_v53  ;;  %v293_v54 = vadd.f32 %v285_v57, %v256_v47  ;;  %v342_v9 = vmul.f32 %v960_v3, %v670_v52  ;;  %v483_v10 = vmul.f32 %v990_v8, %v713_v22  ;;  %v706_v22 = vld [vmem:[%s965_s11 + $0x110] sm:$0xff] }
  0x3b   : > { %v504_v0 = vadd.f32 %v1070_v40, %v490_v58  ;;  %v434_v1 = vadd.f32 %v426_v50, %v405_v59  ;;  %v427_v55 = vmul.f32 %v980_v6, %v696_v42  ;;  %v371_v2 = vmul.f32 %v970_v4, %v679_v60 }
  0x3c   : > { %v378_v12 = vadd.f32 %v370_v56, %v349_v62  ;;  %v321_v13 = vadd.f32 %v313_v37, %v293_v54  ;;  %v456_v17 = vmul.f32 %v985_v7, %v705_v43  ;;  %v399_v19 = vmul.f32 %v975_v5, %v688_v11 }
  0x3d   : > { %513 = vst.msk [vmem:[%s1088_s9 + $0x20] sm:$0xff] %vm508_vm0, %v504_v0  ;;  %v463_v14 = vadd.f32 %v455_v61, %v434_v1  ;;  %v484_v16 = vmul.f32 %v990_v8, %v714_v45  ;;  %v428_v25 = vmul.f32 %v980_v6, %v697_v15  ;;  %v457_v5 = vmul.f32 %v985_v7, %v706_v22 }
  0x3e   : > { %v406_v3 = vadd.f32 %v398_v63, %v378_v12  ;;  %v350_v18 = vadd.f32 %v342_v9, %v321_v13  ;;  %v485_v20 = vmul.f32 %v990_v8, %v715_v26 }
  0x3f   : > { %v491_v21 = vadd.f32 %v483_v10, %v463_v14 }
  0x40   : > { %v435_v23 = vadd.f32 %v427_v55, %v406_v3  ;;  %v379_v4 = vadd.f32 %v371_v2, %v350_v18 }
  0x41   : > { %v505_v24 = vadd.f32 %v1070_v40, %v491_v21 }
  0x42   : > { %v464_v27 = vadd.f32 %v456_v17, %v435_v23  ;;  %v407_v29 = vadd.f32 %v399_v19, %v379_v4 }
  0x43   : > { %514 = vst.msk [vmem:[%s1088_s9 + $0x28] sm:$0xff] %vm508_vm0, %v505_v24 }
  0x44   : > { %v492_v30 = vadd.f32 %v484_v16, %v464_v27  ;;  %v436_v31 = vadd.f32 %v428_v25, %v407_v29 }
  0x46   : > { %v506_v32 = vadd.f32 %v1070_v40, %v492_v30  ;;  %v465_v6 = vadd.f32 %v457_v5, %v436_v31 }
  0x48   : > { %515 = vst.msk [vmem:[%s1088_s9 + $0x30] sm:$0xff] %vm508_vm0, %v506_v32  ;;  %v493_v33 = vadd.f32 %v485_v20, %v465_v6 }
  0x4a   : > { %v507_v7 = vadd.f32 %v1070_v40, %v493_v33 }
  0x4c   : > { %516 = vst.msk [vmem:[%s1088_s9 + $0x38] sm:$0xff] %vm508_vm0, %v507_v7 }
  0x4d   : > { %795 = shalt.err (!%p792_p5)
}
  0x4e   : > { %s796_s29 = scalar_lea.hbm %s1162_s21, 1024  ;;  %s800_s5 = scalar_lea.hbm %s1218_s3, 2048 }
  0x4f   : > { %p797_p6 = scmp.ne.s32.totalorder %s1162_s21, %s796_s29  ;;  %p801_p10 = scmp.lt.u32.totalorder %s1162_s21, %s1218_s3 }
  0x50   : > { %p802_p11 = scmp.lt.u32.totalorder %s800_s5, %s796_s29  ;;  %p804_p13 = scmp.lt.u32.totalorder %s796_s29, %s1162_s21 }
  0x51   : > { %p798_p7 = pnand %p797_p6, %p925_p4 }
  0x52   : > { %p803_p12 = por %p802_p11, %p801_p10 }
  0x53   : > { %p799_p9 = pneg %p798_p7 }
  0x54   : > { %p805_p0 = por %p804_p13, %p803_p12 }
  0x56   : > { %p806_p1 = pnand %p805_p0, %p799_p9 }
  0x58   : > { %809 = shalt.err (!%p806_p1)
}
  0x59   : > { %s863_s8 = smov 128   ;;  %s864_s9 = smov 8  }
  0x5a   : > { %725 = dma.vmem_to_hbm [thread:$0]  (%p925_p4), %s1157_s10, 1024, %s1162_s21, %s1169_s23, %s863_s8, %s863_s8, %s864_s9  }
  0x5b PF: > { %p731_p2 = scmp.ge.s32.totalorder %s860_s17, 2  ;;  %s547_s18 = sand.u32 1, %s840_s12  }
  0x5c   : > { %s548_s11 = scalar_lea.sflag [#allocation3], %s547_s18 }
  0x5d   : > { %p728_p3 = pnand %p731_p2, %p932_p8 }
  0x5f   : > { %835 = dma.done.wait (!%p728_p3), %s548_s11, 1024  }
  0x60   : > { %837 = vsyncadd (!%p728_p3), %s548_s11, 4294966272  ;;  %s16_s17 = sadd.s32 1, %s860_s17   ;;  %s1221_s12 = smov %s844_s13 }
  0x61   : > { %p13_p5 = scmp.ge.s32.totalorder %s16_s17, 4   ;;  %s1222_s13 = smov %s848_s14 }
  0x62   : > { %s1223_s14 = smov %s938_s25  ;;  %s1224_s15 = smov %s856_s16 }
  0x63   : > { %s1225_s16 = smov %s1227_s20  ;;  %15 = sbr.rel (!%p13_p5) target bundleno = 4 (0x4), region = 80 }
  0x6a   :  { %553 = vsyncpa [#allocation3], 1 }
  0x6b   :  { %555 = vsyncpa [#allocation3 + $0x1], 1 }

</bundles_post_ra>
